<compile_context>
chip_gen: v6e
topology: v6e:2x2x1
jax: 0.10.0
libtpu: 0.0.40
codegen_flags: <defaults>
</compile_context>

<pallas_src>
import functools

import jax
import jax.numpy as jnp
from jax.experimental import pallas as pl
from jax.experimental.pallas import tpu as pltpu


def _gnn_kernel(a_ref, h_ref, w_edge_ref, w_gi_in_ref, w_gi_out_ref, w_gh_ref,
                b_edge_ref, b_iah_ref, b_oah_ref, b_gi_ref, b_gh_ref, out_ref,
                *, step, bb, n, hd):
    """One batch block (BB elements) per grid step.

    a_ref        : (BB, N, 2N)  adjacency [in | out]
    h_ref        : (BB, N, H)   hidden state (matmul dtype)
    w_edge_ref   : (H, 2H)      [W_edge_in.T | W_edge_out.T]
    w_gi_in_ref  : (H, 3H)      w_ih[:, :H].T
    w_gi_out_ref : (H, 3H)      w_ih[:, H:].T
    w_gh_ref     : (H, 3H)      w_hh.T
    b_*          : (1, K)       float32 bias rows
    out_ref      : (BB, N, H)
    """
    mm_dtype = w_gh_ref.dtype

    # Biases: load once, outside the step loop (small row vectors; the
    # broadcast happens implicitly inside the adds).
    b_edge = b_edge_ref[...].astype(jnp.float32)   # (1, 2H)
    b_iah = b_iah_ref[...].astype(jnp.float32)     # (1, H)
    b_oah = b_oah_ref[...].astype(jnp.float32)     # (1, H)
    b_gi = b_gi_ref[...].astype(jnp.float32)       # (1, 3H)
    b_gh = b_gh_ref[...].astype(jnp.float32)       # (1, 3H)

    # Adjacency: load once, split the in/out halves with static slices.
    A = a_ref[...]                                  # (BB, N, 2N)
    A_in = A[:, :, :n]                              # (BB, N, N)
    A_out = A[:, :, n:]                             # (BB, N, N)

    def mm(x, w_ref):
        # x: (rows, H) f32 -> cast operands to matmul dtype, accumulate in f32.
        return jnp.dot(x.astype(mm_dtype), w_ref[...],
                       preferred_element_type=jnp.float32)

    def cell(h):
        # h: (BB*N, H) float32
        # Fused edge linears: (BB*N, 2H).
        e = mm(h, w_edge_ref) + b_edge
        e3 = e.reshape(bb, n, 2 * hd)
        ein = e3[:, :, :hd].astype(mm_dtype)        # (BB, N, H)
        eout = e3[:, :, hd:].astype(mm_dtype)       # (BB, N, H)

        # Adjacency aggregation: batched matmuls over the BB block.
        inp_in = jnp.einsum('bij,bjh->bih', A_in, ein,
                            preferred_element_type=jnp.float32
                            ).reshape(bb * n, hd) + b_iah
        inp_out = jnp.einsum('bij,bjh->bih', A_out, eout,
                             preferred_element_type=jnp.float32
                             ).reshape(bb * n, hd) + b_oah

        # Fused gate matmuls: gi, gh are lane-dense (rows, 3H).
        gi = mm(inp_in, w_gi_in_ref) + mm(inp_out, w_gi_out_ref) + b_gi
        gh = mm(h, w_gh_ref) + b_gh

        i_r, i_i, i_n = gi[:, :hd], gi[:, hd:2 * hd], gi[:, 2 * hd:]
        h_r, h_i, h_n = gh[:, :hd], gh[:, hd:2 * hd], gh[:, 2 * hd:]

        # GRU-style gating stays in float32 (VPU/EUP math).
        resetgate = jax.nn.sigmoid(i_r + h_r)
        inputgate = jax.nn.sigmoid(i_i + h_i)
        newgate = jnp.tanh(i_n + resetgate * h_n)
        return newgate + inputgate * (h - newgate)

    h = h_ref[...].reshape(bb * n, hd).astype(jnp.float32)
    if step <= 2:
        for _ in range(step):                       # tiny static unroll
            h = cell(h)
    else:
        h = jax.lax.fori_loop(0, step, lambda _, hh: cell(hh), h)

    out_ref[...] = h.reshape(bb, n, hd).astype(out_ref.dtype)


def _pick_batch_block(B, N, target_rows=256):
    """Pick a batch block that packs ~target_rows rows into each matmul,
    while keeping >= 2 grid steps when possible (v7x has 2 TensorCores)."""
    bb = max(1, min(B, max(1, target_rows // max(N, 1))))
    if bb > 1 and B // bb < 2:
        bb = max(1, B // 2)
    while B % bb != 0:
        bb -= 1
    return bb


def gnn_forward(A, hidden, params, step=1, matmul_dtype=None, batch_block=None):
    """Pallas wrapper. A: [B, N, 2N], hidden: [B, N, H] -> [B, N, H].

    matmul_dtype: dtype for MXU operands (e.g. jnp.bfloat16 on v6e/v7x).
                  Accumulation is always float32; default keeps input dtype.
    """
    B, N, H = hidden.shape
    assert A.shape == (B, N, 2 * N)

    out_dtype = hidden.dtype
    mm_dtype = jnp.dtype(matmul_dtype) if matmul_dtype is not None else hidden.dtype

    bb = batch_block if batch_block is not None else _pick_batch_block(B, N)
    assert B % bb == 0, "batch_block must divide the batch size"
    grid = (B // bb,)

    A_k = A.astype(mm_dtype)
    h_k = hidden.astype(mm_dtype)

    # ---- fused, pre-transposed weights (kernel only does plain x @ W) ----
    w_ih = params["w_ih"]                      # (3H, 2H)
    w_edge = jnp.concatenate(
        [params["w_edge_in"].T, params["w_edge_out"].T], axis=1
    ).astype(mm_dtype)                         # (H, 2H)
    w_gi_in = w_ih[:, :H].T.astype(mm_dtype)   # (H, 3H)
    w_gi_out = w_ih[:, H:].T.astype(mm_dtype)  # (H, 3H)
    w_gh = params["w_hh"].T.astype(mm_dtype)   # (H, 3H)

    # ---- biases (always f32) ----
    b_edge = jnp.concatenate(
        [params["b_edge_in"], params["b_edge_out"]])[None, :].astype(jnp.float32)
    b_iah = params["b_iah"][None, :].astype(jnp.float32)
    b_oah = params["b_oah"][None, :].astype(jnp.float32)
    b_gi = params["b_ih"][None, :].astype(jnp.float32)
    b_gh = params["b_hh"][None, :].astype(jnp.float32)

    kernel = functools.partial(_gnn_kernel, step=step, bb=bb, n=N, hd=H)

    return pl.pallas_call(
        kernel,
        out_shape=jax.ShapeDtypeStruct((B, N, H), out_dtype),
        grid_spec=pltpu.PrefetchScalarGridSpec(
            num_scalar_prefetch=0,
            grid=grid,
            in_specs=[
                pl.BlockSpec((bb, N, 2 * N), lambda b: (b, 0, 0)),  # A
                pl.BlockSpec((bb, N, H), lambda b: (b, 0, 0)),      # hidden
                pl.BlockSpec((H, 2 * H), lambda b: (0, 0)),         # w_edge
                pl.BlockSpec((H, 3 * H), lambda b: (0, 0)),         # w_gi_in
                pl.BlockSpec((H, 3 * H), lambda b: (0, 0)),         # w_gi_out
                pl.BlockSpec((H, 3 * H), lambda b: (0, 0)),         # w_gh
                pl.BlockSpec((1, 2 * H), lambda b: (0, 0)),         # b_edge
                pl.BlockSpec((1, H), lambda b: (0, 0)),             # b_iah
                pl.BlockSpec((1, H), lambda b: (0, 0)),             # b_oah
                pl.BlockSpec((1, 3 * H), lambda b: (0, 0)),         # b_gi
                pl.BlockSpec((1, 3 * H), lambda b: (0, 0)),         # b_gh
            ],
            out_specs=pl.BlockSpec((bb, N, H), lambda b: (b, 0, 0)),
        ),
        compiler_params=pltpu.CompilerParams(
            dimension_semantics=("parallel",)),
    )(A_k, h_k, w_edge, w_gi_in, w_gi_out, w_gh,
      b_edge, b_iah, b_oah, b_gi, b_gh)


def gnn_reference(A, hidden, params, step=1):
    """Pure-JAX re-implementation of the PyTorch forward, for validation."""
    B, N, H = hidden.shape
    for _ in range(step):
        ein = hidden @ params["w_edge_in"].T + params["b_edge_in"]
        eout = hidden @ params["w_edge_out"].T + params["b_edge_out"]
        input_in = jnp.matmul(A[:, :, :N], ein) + params["b_iah"]
        input_out = jnp.matmul(A[:, :, N:2 * N], eout) + params["b_oah"]
        inputs = jnp.concatenate([input_in, input_out], axis=2)
        gi = inputs @ params["w_ih"].T + params["b_ih"]
        gh = hidden @ params["w_hh"].T + params["b_hh"]
        i_r, i_i, i_n = jnp.split(gi, 3, axis=2)
        h_r, h_i, h_n = jnp.split(gh, 3, axis=2)
        resetgate = jax.nn.sigmoid(i_r + h_r)
        inputgate = jax.nn.sigmoid(i_i + h_i)
        newgate = jnp.tanh(i_n + resetgate * h_n)
        hidden = newgate + inputgate * (hidden - newgate)
    return hidden


def init_params(key, hidden_size):
    H = hidden_size
    stdv = 1.0 / (H ** 0.5)
    ks = jax.random.split(key, 10)
    u = lambda k, shape: jax.random.uniform(k, shape, jnp.float32, -stdv, stdv)
    # Note: linear_edge_f is unused in forward(), so it is not materialized.
    return {
        "w_ih": u(ks[0], (3 * H, 2 * H)),
        "w_hh": u(ks[1], (3 * H, H)),
        "b_ih": u(ks[2], (3 * H,)),
        "b_hh": u(ks[3], (3 * H,)),
        "b_iah": u(ks[4], (H,)),
        "b_oah": u(ks[5], (H,)),
        "w_edge_in": u(ks[6], (H, H)),
        "b_edge_in": u(ks[7], (H,)),
        "w_edge_out": u(ks[8], (H, H)),
        "b_edge_out": u(ks[9], (H,)),
    }


if __name__ == "__main__":
    B, N, H = 2, 8, 32
    step = 2

    key = jax.random.PRNGKey(0)
    k_params, k_A, k_h = jax.random.split(key, 3)

    params = init_params(k_params, H)
    # Adjacency-like matrix in [0, 1), shape [B, N, 2N] as in SR-GNN.
    A = jax.random.uniform(k_A, (B, N, 2 * N), jnp.float32)
    hidden = jax.random.normal(k_h, (B, N, H), jnp.float32)

    ref = gnn_reference(A, hidden, params, step=step)

    # float32 operand path: must match the f32 reference tightly.
    out_f32 = jax.block_until_ready(gnn_forward(A, hidden, params, step=step))
    assert out_f32.shape == (B, N, H)
    assert jnp.allclose(out_f32, ref, atol=1e-5, rtol=1e-5), "f32 mismatch vs reference"

    # bf16 matmul-operand path (MXU-friendly on v6e/v7x), f32 accumulation;
    # checked with a looser tolerance.
    out_bf16 = jax.block_until_ready(
        gnn_forward(A, hidden, params, step=step, matmul_dtype=jnp.bfloat16))
    assert out_bf16.shape == (B, N, H)
    assert jnp.allclose(out_bf16.astype(jnp.float32), ref, atol=1e-1, rtol=1e-1), \
        "bf16 mismatch vs reference"

    print("KERNEL_OK")
</pallas_src>

<mosaic_0001>
module attributes {stable_mosaic.version = 11 : i64} {
  func.func @_gnn_kernel(%arg0: i32, %arg1: memref<1x8x16xf32, #tpu.memory_space<vmem>>, %arg2: memref<1x8x32xf32, #tpu.memory_space<vmem>>, %arg3: memref<32x64xf32, #tpu.memory_space<vmem>>, %arg4: memref<32x96xf32, #tpu.memory_space<vmem>>, %arg5: memref<32x96xf32, #tpu.memory_space<vmem>>, %arg6: memref<32x96xf32, #tpu.memory_space<vmem>>, %arg7: memref<1x64xf32, #tpu.memory_space<vmem>>, %arg8: memref<1x32xf32, #tpu.memory_space<vmem>>, %arg9: memref<1x32xf32, #tpu.memory_space<vmem>>, %arg10: memref<1x96xf32, #tpu.memory_space<vmem>>, %arg11: memref<1x96xf32, #tpu.memory_space<vmem>>, %arg12: memref<1x8x32xf32, #tpu.memory_space<vmem>>) attributes {dimension_semantics = [#tpu.dimension_semantics<parallel>], iteration_bounds = array<i64: 2>, scalar_prefetch = 0 : i64, scratch_operands = 0 : i64, tpu.core_type = #tpu.core_type<tc>, window_params = [{transform_indices = @transform_0, window_bounds = array<i64: 1, 8, 16>}, {transform_indices = @transform_1, window_bounds = array<i64: 1, 8, 32>}, {pipeline_mode = #tpu.pipeline_mode<synchronous>, transform_indices = @transform_2, window_bounds = array<i64: 32, 64>}, {pipeline_mode = #tpu.pipeline_mode<synchronous>, transform_indices = @transform_3, window_bounds = array<i64: 32, 96>}, {pipeline_mode = #tpu.pipeline_mode<synchronous>, transform_indices = @transform_4, window_bounds = array<i64: 32, 96>}, {pipeline_mode = #tpu.pipeline_mode<synchronous>, transform_indices = @transform_5, window_bounds = array<i64: 32, 96>}, {pipeline_mode = #tpu.pipeline_mode<synchronous>, transform_indices = @transform_6, window_bounds = array<i64: 1, 64>}, {pipeline_mode = #tpu.pipeline_mode<synchronous>, transform_indices = @transform_7, window_bounds = array<i64: 1, 32>}, {pipeline_mode = #tpu.pipeline_mode<synchronous>, transform_indices = @transform_8, window_bounds = array<i64: 1, 32>}, {pipeline_mode = #tpu.pipeline_mode<synchronous>, transform_indices = @transform_9, window_bounds = array<i64: 1, 96>}, {pipeline_mode = #tpu.pipeline_mode<synchronous>, transform_indices = @transform_10, window_bounds = array<i64: 1, 96>}, {transform_indices = @transform_11, window_bounds = array<i64: 1, 8, 32>}]} {
    %c0 = arith.constant 0 : index
    %c0_0 = arith.constant 0 : index
    %0 = vector.load %arg7[%c0, %c0_0] : memref<1x64xf32, #tpu.memory_space<vmem>>, vector<1x64xf32>
    %c0_1 = arith.constant 0 : index
    %c0_2 = arith.constant 0 : index
    %1 = vector.load %arg8[%c0_1, %c0_2] : memref<1x32xf32, #tpu.memory_space<vmem>>, vector<1x32xf32>
    %c0_3 = arith.constant 0 : index
    %c0_4 = arith.constant 0 : index
    %2 = vector.load %arg9[%c0_3, %c0_4] : memref<1x32xf32, #tpu.memory_space<vmem>>, vector<1x32xf32>
    %c0_5 = arith.constant 0 : index
    %c0_6 = arith.constant 0 : index
    %3 = vector.load %arg10[%c0_5, %c0_6] : memref<1x96xf32, #tpu.memory_space<vmem>>, vector<1x96xf32>
    %c0_7 = arith.constant 0 : index
    %c0_8 = arith.constant 0 : index
    %4 = vector.load %arg11[%c0_7, %c0_8] : memref<1x96xf32, #tpu.memory_space<vmem>>, vector<1x96xf32>
    %c0_9 = arith.constant 0 : index
    %c0_10 = arith.constant 0 : index
    %c0_11 = arith.constant 0 : index
    %5 = vector.load %arg1[%c0_9, %c0_10, %c0_11] : memref<1x8x16xf32, #tpu.memory_space<vmem>>, vector<1x8x16xf32>
    %6 = vector.extract_strided_slice %5 {offsets = [0, 0, 0], sizes = [1, 8, 8], strides = [1, 1, 1]} : vector<1x8x16xf32> to vector<1x8x8xf32>
    %7 = vector.extract_strided_slice %5 {offsets = [0, 0, 8], sizes = [1, 8, 8], strides = [1, 1, 1]} : vector<1x8x16xf32> to vector<1x8x8xf32>
    %c0_12 = arith.constant 0 : index
    %c0_13 = arith.constant 0 : index
    %c0_14 = arith.constant 0 : index
    %8 = vector.load %arg2[%c0_12, %c0_13, %c0_14] : memref<1x8x32xf32, #tpu.memory_space<vmem>>, vector<1x8x32xf32>
    %9 = vector.shape_cast %8 : vector<1x8x32xf32> to vector<8x32xf32>
    %c0_15 = arith.constant 0 : index
    %c0_16 = arith.constant 0 : index
    %10 = vector.load %arg3[%c0_15, %c0_16] : memref<32x64xf32, #tpu.memory_space<vmem>>, vector<32x64xf32>
    %cst = arith.constant dense<0.000000e+00> : vector<8x64xf32>
    %11 = tpu.matmul %9, %10, %cst {dimension_numbers = #tpu.dot_dimension_numbers<[1], [0], [0], [1], [0, 0, 1, 1], [], []>} : vector<8x32xf32>, vector<32x64xf32>, vector<8x64xf32> -> vector<8x64xf32>
    %12 = vector.broadcast %0 : vector<1x64xf32> to vector<8x64xf32>
    %13 = arith.addf %11, %12 : vector<8x64xf32>
    %14 = vector.shape_cast %13 : vector<8x64xf32> to vector<1x8x64xf32>
    %15 = vector.extract_strided_slice %14 {offsets = [0, 0, 0], sizes = [1, 8, 32], strides = [1, 1, 1]} : vector<1x8x64xf32> to vector<1x8x32xf32>
    %16 = vector.extract_strided_slice %14 {offsets = [0, 0, 32], sizes = [1, 8, 32], strides = [1, 1, 1]} : vector<1x8x64xf32> to vector<1x8x32xf32>
    "tpu.trace_start"() <{level = 10 : i32, message = "bij,bjh->bih"}> : () -> ()
    %cst_17 = arith.constant dense<0.000000e+00> : vector<1x8x32xf32>
    %17 = tpu.matmul %6, %15, %cst_17 {dimension_numbers = #tpu.dot_dimension_numbers<[2], [1], [1], [2], [0, 0, 0, 1, 1, 2], [0], [0]>} : vector<1x8x8xf32>, vector<1x8x32xf32>, vector<1x8x32xf32> -> vector<1x8x32xf32>
    "tpu.trace_stop"() : () -> ()
    %18 = vector.shape_cast %17 : vector<1x8x32xf32> to vector<8x32xf32>
    %19 = vector.broadcast %1 : vector<1x32xf32> to vector<8x32xf32>
    %20 = arith.addf %18, %19 : vector<8x32xf32>
    "tpu.trace_start"() <{level = 10 : i32, message = "bij,bjh->bih"}> : () -> ()
    %cst_18 = arith.constant dense<0.000000e+00> : vector<1x8x32xf32>
    %21 = tpu.matmul %7, %16, %cst_18 {dimension_numbers = #tpu.dot_dimension_numbers<[2], [1], [1], [2], [0, 0, 0, 1, 1, 2], [0], [0]>} : vector<1x8x8xf32>, vector<1x8x32xf32>, vector<1x8x32xf32> -> vector<1x8x32xf32>
    "tpu.trace_stop"() : () -> ()
    %22 = vector.shape_cast %21 : vector<1x8x32xf32> to vector<8x32xf32>
    %23 = vector.broadcast %2 : vector<1x32xf32> to vector<8x32xf32>
    %24 = arith.addf %22, %23 : vector<8x32xf32>
    %c0_19 = arith.constant 0 : index
    %c0_20 = arith.constant 0 : index
    %25 = vector.load %arg4[%c0_19, %c0_20] : memref<32x96xf32, #tpu.memory_space<vmem>>, vector<32x96xf32>
    %cst_21 = arith.constant dense<0.000000e+00> : vector<8x96xf32>
    %26 = tpu.matmul %20, %25, %cst_21 {dimension_numbers = #tpu.dot_dimension_numbers<[1], [0], [0], [1], [0, 0, 1, 1], [], []>} : vector<8x32xf32>, vector<32x96xf32>, vector<8x96xf32> -> vector<8x96xf32>
    %c0_22 = arith.constant 0 : index
    %c0_23 = arith.constant 0 : index
    %27 = vector.load %arg5[%c0_22, %c0_23] : memref<32x96xf32, #tpu.memory_space<vmem>>, vector<32x96xf32>
    %cst_24 = arith.constant dense<0.000000e+00> : vector<8x96xf32>
    %28 = tpu.matmul %24, %27, %cst_24 {dimension_numbers = #tpu.dot_dimension_numbers<[1], [0], [0], [1], [0, 0, 1, 1], [], []>} : vector<8x32xf32>, vector<32x96xf32>, vector<8x96xf32> -> vector<8x96xf32>
    %29 = arith.addf %26, %28 : vector<8x96xf32>
    %30 = vector.broadcast %3 : vector<1x96xf32> to vector<8x96xf32>
    %31 = arith.addf %29, %30 : vector<8x96xf32>
    %c0_25 = arith.constant 0 : index
    %c0_26 = arith.constant 0 : index
    %32 = vector.load %arg6[%c0_25, %c0_26] : memref<32x96xf32, #tpu.memory_space<vmem>>, vector<32x96xf32>
    %cst_27 = arith.constant dense<0.000000e+00> : vector<8x96xf32>
    %33 = tpu.matmul %9, %32, %cst_27 {dimension_numbers = #tpu.dot_dimension_numbers<[1], [0], [0], [1], [0, 0, 1, 1], [], []>} : vector<8x32xf32>, vector<32x96xf32>, vector<8x96xf32> -> vector<8x96xf32>
    %34 = vector.broadcast %4 : vector<1x96xf32> to vector<8x96xf32>
    %35 = arith.addf %33, %34 : vector<8x96xf32>
    %36 = vector.extract_strided_slice %31 {offsets = [0, 0], sizes = [8, 32], strides = [1, 1]} : vector<8x96xf32> to vector<8x32xf32>
    %37 = vector.extract_strided_slice %31 {offsets = [0, 32], sizes = [8, 32], strides = [1, 1]} : vector<8x96xf32> to vector<8x32xf32>
    %38 = vector.extract_strided_slice %31 {offsets = [0, 64], sizes = [8, 32], strides = [1, 1]} : vector<8x96xf32> to vector<8x32xf32>
    %39 = vector.extract_strided_slice %35 {offsets = [0, 0], sizes = [8, 32], strides = [1, 1]} : vector<8x96xf32> to vector<8x32xf32>
    %40 = vector.extract_strided_slice %35 {offsets = [0, 32], sizes = [8, 32], strides = [1, 1]} : vector<8x96xf32> to vector<8x32xf32>
    %41 = vector.extract_strided_slice %35 {offsets = [0, 64], sizes = [8, 32], strides = [1, 1]} : vector<8x96xf32> to vector<8x32xf32>
    %42 = arith.addf %36, %39 : vector<8x32xf32>
    %43 = arith.negf %42 : vector<8x32xf32>
    %44 = math.exp %43 : vector<8x32xf32>
    %cst_28 = arith.constant 1.000000e+00 : f32
    %45 = vector.broadcast %cst_28 : f32 to vector<8x32xf32>
    %46 = arith.addf %45, %44 : vector<8x32xf32>
    %47 = arith.divf %45, %46 : vector<8x32xf32>
    %48 = arith.addf %37, %40 : vector<8x32xf32>
    %49 = arith.negf %48 : vector<8x32xf32>
    %50 = math.exp %49 : vector<8x32xf32>
    %cst_29 = arith.constant 1.000000e+00 : f32
    %51 = vector.broadcast %cst_29 : f32 to vector<8x32xf32>
    %52 = arith.addf %51, %50 : vector<8x32xf32>
    %53 = arith.divf %51, %52 : vector<8x32xf32>
    %54 = arith.mulf %47, %41 : vector<8x32xf32>
    %55 = arith.addf %38, %54 : vector<8x32xf32>
    %56 = math.tanh %55 : vector<8x32xf32>
    %57 = arith.subf %9, %56 : vector<8x32xf32>
    %58 = arith.mulf %53, %57 : vector<8x32xf32>
    %59 = arith.addf %56, %58 : vector<8x32xf32>
    %c0_30 = arith.constant 0 : index
    %c0_31 = arith.constant 0 : index
    %60 = vector.load %arg3[%c0_30, %c0_31] : memref<32x64xf32, #tpu.memory_space<vmem>>, vector<32x64xf32>
    %cst_32 = arith.constant dense<0.000000e+00> : vector<8x64xf32>
    %61 = tpu.matmul %59, %60, %cst_32 {dimension_numbers = #tpu.dot_dimension_numbers<[1], [0], [0], [1], [0, 0, 1, 1], [], []>} : vector<8x32xf32>, vector<32x64xf32>, vector<8x64xf32> -> vector<8x64xf32>
    %62 = vector.broadcast %0 : vector<1x64xf32> to vector<8x64xf32>
    %63 = arith.addf %61, %62 : vector<8x64xf32>
    %64 = vector.shape_cast %63 : vector<8x64xf32> to vector<1x8x64xf32>
    %65 = vector.extract_strided_slice %64 {offsets = [0, 0, 0], sizes = [1, 8, 32], strides = [1, 1, 1]} : vector<1x8x64xf32> to vector<1x8x32xf32>
    %66 = vector.extract_strided_slice %64 {offsets = [0, 0, 32], sizes = [1, 8, 32], strides = [1, 1, 1]} : vector<1x8x64xf32> to vector<1x8x32xf32>
    "tpu.trace_start"() <{level = 10 : i32, message = "bij,bjh->bih"}> : () -> ()
    %cst_33 = arith.constant dense<0.000000e+00> : vector<1x8x32xf32>
    %67 = tpu.matmul %6, %65, %cst_33 {dimension_numbers = #tpu.dot_dimension_numbers<[2], [1], [1], [2], [0, 0, 0, 1, 1, 2], [0], [0]>} : vector<1x8x8xf32>, vector<1x8x32xf32>, vector<1x8x32xf32> -> vector<1x8x32xf32>
    "tpu.trace_stop"() : () -> ()
    %68 = vector.shape_cast %67 : vector<1x8x32xf32> to vector<8x32xf32>
    %69 = vector.broadcast %1 : vector<1x32xf32> to vector<8x32xf32>
    %70 = arith.addf %68, %69 : vector<8x32xf32>
    "tpu.trace_start"() <{level = 10 : i32, message = "bij,bjh->bih"}> : () -> ()
    %cst_34 = arith.constant dense<0.000000e+00> : vector<1x8x32xf32>
    %71 = tpu.matmul %7, %66, %cst_34 {dimension_numbers = #tpu.dot_dimension_numbers<[2], [1], [1], [2], [0, 0, 0, 1, 1, 2], [0], [0]>} : vector<1x8x8xf32>, vector<1x8x32xf32>, vector<1x8x32xf32> -> vector<1x8x32xf32>
    "tpu.trace_stop"() : () -> ()
    %72 = vector.shape_cast %71 : vector<1x8x32xf32> to vector<8x32xf32>
    %73 = vector.broadcast %2 : vector<1x32xf32> to vector<8x32xf32>
    %74 = arith.addf %72, %73 : vector<8x32xf32>
    %c0_35 = arith.constant 0 : index
    %c0_36 = arith.constant 0 : index
    %75 = vector.load %arg4[%c0_35, %c0_36] : memref<32x96xf32, #tpu.memory_space<vmem>>, vector<32x96xf32>
    %cst_37 = arith.constant dense<0.000000e+00> : vector<8x96xf32>
    %76 = tpu.matmul %70, %75, %cst_37 {dimension_numbers = #tpu.dot_dimension_numbers<[1], [0], [0], [1], [0, 0, 1, 1], [], []>} : vector<8x32xf32>, vector<32x96xf32>, vector<8x96xf32> -> vector<8x96xf32>
    %c0_38 = arith.constant 0 : index
    %c0_39 = arith.constant 0 : index
    %77 = vector.load %arg5[%c0_38, %c0_39] : memref<32x96xf32, #tpu.memory_space<vmem>>, vector<32x96xf32>
    %cst_40 = arith.constant dense<0.000000e+00> : vector<8x96xf32>
    %78 = tpu.matmul %74, %77, %cst_40 {dimension_numbers = #tpu.dot_dimension_numbers<[1], [0], [0], [1], [0, 0, 1, 1], [], []>} : vector<8x32xf32>, vector<32x96xf32>, vector<8x96xf32> -> vector<8x96xf32>
    %79 = arith.addf %76, %78 : vector<8x96xf32>
    %80 = vector.broadcast %3 : vector<1x96xf32> to vector<8x96xf32>
    %81 = arith.addf %79, %80 : vector<8x96xf32>
    %c0_41 = arith.constant 0 : index
    %c0_42 = arith.constant 0 : index
    %82 = vector.load %arg6[%c0_41, %c0_42] : memref<32x96xf32, #tpu.memory_space<vmem>>, vector<32x96xf32>
    %cst_43 = arith.constant dense<0.000000e+00> : vector<8x96xf32>
    %83 = tpu.matmul %59, %82, %cst_43 {dimension_numbers = #tpu.dot_dimension_numbers<[1], [0], [0], [1], [0, 0, 1, 1], [], []>} : vector<8x32xf32>, vector<32x96xf32>, vector<8x96xf32> -> vector<8x96xf32>
    %84 = vector.broadcast %4 : vector<1x96xf32> to vector<8x96xf32>
    %85 = arith.addf %83, %84 : vector<8x96xf32>
    %86 = vector.extract_strided_slice %81 {offsets = [0, 0], sizes = [8, 32], strides = [1, 1]} : vector<8x96xf32> to vector<8x32xf32>
    %87 = vector.extract_strided_slice %81 {offsets = [0, 32], sizes = [8, 32], strides = [1, 1]} : vector<8x96xf32> to vector<8x32xf32>
    %88 = vector.extract_strided_slice %81 {offsets = [0, 64], sizes = [8, 32], strides = [1, 1]} : vector<8x96xf32> to vector<8x32xf32>
    %89 = vector.extract_strided_slice %85 {offsets = [0, 0], sizes = [8, 32], strides = [1, 1]} : vector<8x96xf32> to vector<8x32xf32>
    %90 = vector.extract_strided_slice %85 {offsets = [0, 32], sizes = [8, 32], strides = [1, 1]} : vector<8x96xf32> to vector<8x32xf32>
    %91 = vector.extract_strided_slice %85 {offsets = [0, 64], sizes = [8, 32], strides = [1, 1]} : vector<8x96xf32> to vector<8x32xf32>
    %92 = arith.addf %86, %89 : vector<8x32xf32>
    %93 = arith.negf %92 : vector<8x32xf32>
    %94 = math.exp %93 : vector<8x32xf32>
    %cst_44 = arith.constant 1.000000e+00 : f32
    %95 = vector.broadcast %cst_44 : f32 to vector<8x32xf32>
    %96 = arith.addf %95, %94 : vector<8x32xf32>
    %97 = arith.divf %95, %96 : vector<8x32xf32>
    %98 = arith.addf %87, %90 : vector<8x32xf32>
    %99 = arith.negf %98 : vector<8x32xf32>
    %100 = math.exp %99 : vector<8x32xf32>
    %cst_45 = arith.constant 1.000000e+00 : f32
    %101 = vector.broadcast %cst_45 : f32 to vector<8x32xf32>
    %102 = arith.addf %101, %100 : vector<8x32xf32>
    %103 = arith.divf %101, %102 : vector<8x32xf32>
    %104 = arith.mulf %97, %91 : vector<8x32xf32>
    %105 = arith.addf %88, %104 : vector<8x32xf32>
    %106 = math.tanh %105 : vector<8x32xf32>
    %107 = arith.subf %59, %106 : vector<8x32xf32>
    %108 = arith.mulf %103, %107 : vector<8x32xf32>
    %109 = arith.addf %106, %108 : vector<8x32xf32>
    %110 = vector.shape_cast %109 : vector<8x32xf32> to vector<1x8x32xf32>
    %c0_46 = arith.constant 0 : index
    %c0_47 = arith.constant 0 : index
    %c0_48 = arith.constant 0 : index
    %111 = vector.load %arg12[%c0_46, %c0_47, %c0_48] : memref<1x8x32xf32, #tpu.memory_space<vmem>>, vector<1x8x32xf32>
    tpu.vector_store %arg12[%c0_46, %c0_47, %c0_48], %110 {strides = array<i32>} : memref<1x8x32xf32, #tpu.memory_space<vmem>>, vector<1x8x32xf32>,
    return
  }
  func.func @transform_0(%arg0: i32) -> (i32, i32, i32) {
    %c0_i32 = arith.constant 0 : i32
    %c0_i32_0 = arith.constant 0 : i32
    %c0_i32_1 = arith.constant 0 : i32
    return %arg0, %c0_i32, %c0_i32_0 : i32, i32, i32
  }
  func.func @transform_1(%arg0: i32) -> (i32, i32, i32) {
    %c0_i32 = arith.constant 0 : i32
    %c0_i32_0 = arith.constant 0 : i32
    %c0_i32_1 = arith.constant 0 : i32
    return %arg0, %c0_i32, %c0_i32_0 : i32, i32, i32
  }
  func.func @transform_2(%arg0: i32) -> (i32, i32) {
    %c0_i32 = arith.constant 0 : i32
    %c0_i32_0 = arith.constant 0 : i32
    %c0_i32_1 = arith.constant 0 : i32
    return %c0_i32, %c0_i32_0 : i32, i32
  }
  func.func @transform_3(%arg0: i32) -> (i32, i32) {
    %c0_i32 = arith.constant 0 : i32
    %c0_i32_0 = arith.constant 0 : i32
    %c0_i32_1 = arith.constant 0 : i32
    return %c0_i32, %c0_i32_0 : i32, i32
  }
  func.func @transform_4(%arg0: i32) -> (i32, i32) {
    %c0_i32 = arith.constant 0 : i32
    %c0_i32_0 = arith.constant 0 : i32
    %c0_i32_1 = arith.constant 0 : i32
    return %c0_i32, %c0_i32_0 : i32, i32
  }
  func.func @transform_5(%arg0: i32) -> (i32, i32) {
    %c0_i32 = arith.constant 0 : i32
    %c0_i32_0 = arith.constant 0 : i32
    %c0_i32_1 = arith.constant 0 : i32
    return %c0_i32, %c0_i32_0 : i32, i32
  }
  func.func @transform_6(%arg0: i32) -> (i32, i32) {
    %c0_i32 = arith.constant 0 : i32
    %c0_i32_0 = arith.constant 0 : i32
    %c0_i32_1 = arith.constant 0 : i32
    return %c0_i32, %c0_i32_0 : i32, i32
  }
  func.func @transform_7(%arg0: i32) -> (i32, i32) {
    %c0_i32 = arith.constant 0 : i32
    %c0_i32_0 = arith.constant 0 : i32
    %c0_i32_1 = arith.constant 0 : i32
    return %c0_i32, %c0_i32_0 : i32, i32
  }
  func.func @transform_8(%arg0: i32) -> (i32, i32) {
    %c0_i32 = arith.constant 0 : i32
    %c0_i32_0 = arith.constant 0 : i32
    %c0_i32_1 = arith.constant 0 : i32
    return %c0_i32, %c0_i32_0 : i32, i32
  }
  func.func @transform_9(%arg0: i32) -> (i32, i32) {
    %c0_i32 = arith.constant 0 : i32
    %c0_i32_0 = arith.constant 0 : i32
    %c0_i32_1 = arith.constant 0 : i32
    return %c0_i32, %c0_i32_0 : i32, i32
  }
  func.func @transform_10(%arg0: i32) -> (i32, i32) {
    %c0_i32 = arith.constant 0 : i32
    %c0_i32_0 = arith.constant 0 : i32
    %c0_i32_1 = arith.constant 0 : i32
    return %c0_i32, %c0_i32_0 : i32, i32
  }
  func.func @transform_11(%arg0: i32) -> (i32, i32, i32) {
    %c0_i32 = arith.constant 0 : i32
    %c0_i32_0 = arith.constant 0 : i32
    %c0_i32_1 = arith.constant 0 : i32
    return %arg0, %c0_i32, %c0_i32_0 : i32, i32, i32
  }
}

</mosaic_0001>

<bundles_post_ra>
// kernel: tpu_custom_call.1
= control target key start
LH: loop header
LB: loop body
LE: loop exit
PB: predicated region body
PF: predicated region fallthrough
CT: control target
= control target key end

     0   :  { %s2766_s0 = inlined_call_operand.hbm [shape: f32[2,8,16], index: 0, kind: input, shape index: {}]   ;;  %s2767_s1 = inlined_call_operand.hbm [shape: f32[2,8,32], index: 1, kind: input, shape index: {}]   ;;  %s2768_s2 = inlined_call_operand.hbm [shape: f32[32,64], index: 2, kind: input, shape index: {}]   ;;  %s2769_s3 = inlined_call_operand.hbm [shape: f32[32,96], index: 3, kind: input, shape index: {}]   ;;  %s2770_s4 = inlined_call_operand.hbm [shape: f32[32,96], index: 4, kind: input, shape index: {}]   ;;  %s2771_s5 = inlined_call_operand.hbm [shape: f32[32,96], index: 5, kind: input, shape index: {}]   ;;  %s2772_s6 = inlined_call_operand.vmem [shape: f32[1,64], index: 6, kind: input, shape index: {}]   ;;  %s2773_s7 = inlined_call_operand.vmem [shape: f32[1,32], index: 7, kind: input, shape index: {}]   ;;  %s2774_s8 = inlined_call_operand.vmem [shape: f32[1,32], index: 8, kind: input, shape index: {}]   ;;  %s2775_s9 = inlined_call_operand.vmem [shape: f32[1,96], index: 9, kind: input, shape index: {}]   ;;  %s2776_s10 = inlined_call_operand.vmem [shape: f32[1,96], index: 10, kind: input, shape index: {}]   ;;  %s2777_s11 = inlined_call_operand.hbm [shape: f32[2,8,32], index: 11, kind: output, shape index: {}]  }
   0x1   :  { %2786 = sst [smem:[#allocation24_spill]] %s2768_s2 }
   0x2   :  { %2787 = sst [smem:[#allocation25_spill]] %s2769_s3 }
   0x3   :  { %2788 = sst [smem:[#allocation26_spill]] %s2770_s4 }
   0x4   :  { %2789 = sst [smem:[#allocation27_spill]] %s2771_s5 }
   0x5   :  { %16 = vsyncpa [#allocation3], 0 }
   0x6   :  { %18 = vsyncpa [#allocation3 + $0x1], 0 }
   0x7   :  { %19 = vsyncpa [#allocation6], 0 }
   0x8   :  { %21 = vsyncpa [#allocation6 + $0x1], 0 }
   0x9   :  { %22 = vsyncpa [#allocation9], 0 }
   0xa   :  { %23 = vsyncpa [#allocation12], 0 }
   0xb   :  { %24 = vsyncpa [#allocation4], 0 }
   0xc   :  { %26 = vsyncpa [#allocation4 + $0x1], 0  ;;  %s2284_s17 = smov 0   ;;  %s2286_s18 = smov 0  }
   0xd   :  { %s2288_s19 = smov 0   ;;  %s2290_s20 = smov 0  }
   0xe LB: > { %2790 = sst [smem:[#allocation20_spill]] %s2203_s19  ;;  %s2209_s21 = smov [#allocation7]   ;;  %s2207_s20 = sphi %s2290_s20, %s2817_s20   ;;  %s2203_s19 = sphi %s2288_s19, %s2819_s19   ;;  %s2199_s18 = sphi %s2286_s18, %s2821_s18   ;;  %s2195_s17 = sphi %s2284_s17, %s2820_s17  }
   0xf   : > { %s316_s22 = sshll.u32 %s2209_s21, 4  ;;  %s2305_s23 = sadd.s32 4294967295, %s2207_s20   ;;  %s317_s22 = int_to_ptr.vmem [resolvable:$true] %s316_s22 }
  0x10   : > { %p1658_p0 = scmp.ge.s32.totalorder %s2207_s20, 1  ;;  %p2782_p1 = scmp.eq.s32.totalorder %s2305_s23, 0 }
  0x11   : > { %p304_p2 = scmp.lt.s32.totalorder %s2207_s20, 3  ;;  %s2210_s25 = smov [#allocation8]  }
  0x12   : > { %s329_s26 = sshll.u32 %s2210_s25, 4  ;;  %s2211_s28 = smov [#allocation10]   ;;  %s2323_s26 = int_to_ptr.vmem [resolvable:$true] %s329_s26 }
  0x13   : > { %p2310_p3 = pnand %p1658_p0, %p304_p2  ;;  %s342_s29 = sshll.u32 %s2211_s28, 4  ;;  %s2325_s29 = int_to_ptr.vmem [resolvable:$true] %s342_s29 }
  0x14   : > { %s1978_s30 = scalar_lea.vmem %s317_s22, 512  ;;  %p1986_p11 = scmp.lt.s32.totalorder %s317_s22, %s317_s22 }
  0x15   : > { %s2791_s24 = scalar_select %p2310_p3, 1, 0 }
  0x16   : > { %p1877_p5 = pneg %p2310_p3  ;;  %p1979_p8 = scmp.ne.s32.totalorder %s317_s22, %s1978_s30 }
  0x17   : > { %p1987_p12 = scmp.lt.s32.totalorder %s1978_s30, %s1978_s30 }
  0x18   : > { %p2319_p6 = pnand %p1877_p5, %p2782_p1 }
  0x19   : > { %p1988_p13 = por %p1987_p12, %p1986_p11 }
  0x1a   : > { %p1969_p7 = pneg %p2319_p6 }
  0x1c   : > { %p1981_p9 = pnand %p1979_p8, %p1969_p7 }
  0x1e   : > { %p1982_p10 = pneg %p1981_p9 }
  0x20   : > { %p1989_p0 = pnand %p1988_p13, %p1982_p10 }
  0x22   : > { %1992 = shalt.err (!%p1989_p0)
}
  0x23   : > { %s2212_s12 = smov 128   ;;  %s2213_s13 = smov 8  }
  0x24   : > { %s2793_s2 = sld [smem:[#allocation24_spill]]  ;;  %s2004_s16 = scalar_lea.vmem %s2323_s26, 512 }
  0x25   : > { %p2005_p2 = scmp.ne.s32.totalorder %s2323_s26, %s2004_s16  ;;  %p2012_p9 = scmp.lt.s32.totalorder %s2323_s26, %s2323_s26 }
  0x26   : > { %p2013_p10 = scmp.lt.s32.totalorder %s2004_s16, %s2004_s16 }
  0x27   : > { %p2007_p5 = pnand %p2005_p2, %p1969_p7 }
  0x28   : > { %p2014_p11 = por %p2013_p10, %p2012_p9 }
  0x29   : > { %p2008_p8 = pneg %p2007_p5 }
  0x2a   : > { %1880 = dma.hbm_to_vmem [thread:$0]  (!%p2319_p6), %s2793_s2, 512, %s317_s22, [#allocation6], %s2212_s12, %s2212_s12, %s2213_s13  }
  0x2b   : > { %p2015_p12 = pnand %p2014_p11, %p2008_p8 }
  0x2d   : > { %2018 = shalt.err (!%p2015_p12)
}
  0x2e   : > { %s2794_s3 = sld [smem:[#allocation25_spill]]  ;;  %s2030_s25 = scalar_lea.vmem %s2325_s29, 512 }
  0x2f   : > { %p2031_p13 = scmp.ne.s32.totalorder %s2325_s29, %s2030_s25  ;;  %p2038_p5 = scmp.lt.s32.totalorder %s2325_s29, %s2325_s29 }
  0x30   : > { %p2039_p8 = scmp.lt.s32.totalorder %s2030_s25, %s2030_s25 }
  0x31   : > { %p2033_p0 = pnand %p2031_p13, %p1969_p7 }
  0x32   : > { %p2040_p9 = por %p2039_p8, %p2038_p5 }
  0x33   : > { %p2034_p2 = pneg %p2033_p0 }
  0x34   : > { %1883 = dma.hbm_to_vmem [thread:$0]  (!%p2319_p6), %s2794_s3, 512, %s2323_s26, [#allocation9], %s2212_s12, %s2212_s12, %s2213_s13  }
  0x35   : > { %p2041_p10 = pnand %p2040_p9, %p2034_p2 }
  0x37   : > { %2044 = shalt.err (!%p2041_p10)
}
  0x38   : > { %s2795_s4 = sld [smem:[#allocation26_spill]]  ;;  %s2214_s30 = smov [#allocation11]  }
  0x39   : > { %s355_s14 = sshll.u32 %s2214_s30, 4  ;;  %s356_s14 = int_to_ptr.vmem [resolvable:$true] %s355_s14 }
  0x3a   : > { %s2056_s15 = scalar_lea.vmem %s356_s14, 512  ;;  %p2064_p0 = scmp.lt.s32.totalorder %s356_s14, %s356_s14 }
  0x3b   : > { %p2057_p11 = scmp.ne.s32.totalorder %s356_s14, %s2056_s15  ;;  %p2065_p2 = scmp.lt.s32.totalorder %s2056_s15, %s2056_s15 }
  0x3d   : > { %p2059_p12 = pnand %p2057_p11, %p1969_p7  ;;  %p2066_p5 = por %p2065_p2, %p2064_p0 }
  0x3e   : > { %1886 = dma.hbm_to_vmem [thread:$0]  (!%p2319_p6), %s2795_s4, 512, %s2325_s29, [#allocation9], %s2212_s12, %s2212_s12, %s2213_s13  }
  0x3f   : > { %p2060_p13 = pneg %p2059_p12 }
  0x41   : > { %p2067_p8 = pnand %p2066_p5, %p2060_p13 }
  0x43   : > { %2070 = shalt.err (!%p2067_p8)
}
  0x44   : > { %s2796_s5 = sld [smem:[#allocation27_spill]]  ;;  %s1657_s27 = sadd.s32 4294967294, %s2207_s20  }
  0x45   : > { %s2385_s21 = sadd.s32 1, %s2207_s20   ;;  %s39_s25 = sadd.s32 1, %s2203_s19 }
  0x46   : > { %2797 = sst [smem:[#allocation21_spill]] %s2385_s21  ;;  %s36_s22 = ssub.s32 %s2207_s20, %s2385_s21 }
  0x47   : > { %p37_p7 = scmp.eq.s32.totalorder %s36_s22, 0  ;;  %p46_p9 = scmp.ne.s32.totalorder %s2203_s19, %s2199_s18 }
  0x48   : > { %p47_p10 = scmp.eq.s32.totalorder %s2207_s20, 0  ;;  %p52_p11 = scmp.ne.s32.totalorder %s2199_s18, %s2195_s17 }
  0x49   : > { %s2396_s28 = scalar_select %p37_p7, %s2203_s19, %s39_s25  }
  0x4a   : > { %1889 = dma.hbm_to_vmem [thread:$0]  (!%p2319_p6), %s2796_s5, 512, %s356_s14, [#allocation12], %s2212_s12, %s2212_s12, %s2213_s13  }
  0x4b   : > { %2798 = sst [smem:[#allocation22_spill]] %s2396_s28  ;;  %p2398_p12 = por %p47_p10, %p46_p9 }
  0x4c   : > { %p2404_p6 = por %p2782_p1, %p52_p11  ;;  %p291_p13 = scmp.eq.s32.totalorder %s2305_s23, 1 }
  0x4d   : > { %p297_p0 = scmp.eq.s32.totalorder %s1657_s27, 1  ;;  %p1905_p2 = scmp.lt.s32.totalorder %s2207_s20, 2 }
  0x4e   : > { %s2800_s12 = scalar_select %p2404_p6, 1, 0 }
  0x4f   : > { %s384_s13 = sand.u32 1, %s2203_s19   ;;  %p2411_p5 = por %p291_p13, %p46_p9 }
  0x50   : > { %p2415_p8 = por %p297_p0, %p52_p11  ;;  %s2419_s15 = sshll.u32 %s384_s13, 3 }
  0x51   : > { %s2801_s30 = scalar_select %p2411_p5, 1, 0 }
  0x52   : > { %s2802_s14 = scalar_select %p2415_p8, 1, 0 }
  0x53   : > { %s1665_s29 = sshll.u32 %s2207_s20, 7  ;;  %s388_s27 = scalar_lea.vmem [#allocation2], %s2419_s15 }
  0x54   : > { %2803 = sst [smem:[#allocation23_spill]] %s2802_s14  ;;  %s2425_s25 = scalar_lea.hbm %s2766_s0, %s1665_s29 }
  0x55   : > { %s395_s2 = sshll.u32 %s388_s27, 4  ;;  %p2432_p7 = pnand %p1905_p2, %p2398_p12  ;;  %s2428_s2 = int_to_ptr.vmem [resolvable:$true] %s395_s2 }
  0x56   : > { %s2439_s16 = scalar_lea.hbm %s2767_s1, %s1665_s29  ;;  %s402_s22 = sand.u32 1, %s2207_s20  }
  0x57   : > { %s385_s28 = scalar_lea.sflag [#allocation3], %s384_s13  ;;  %s2071_s19 = scalar_lea.hbm %s2425_s25, 128 }
  0x58   : > { %p2072_p9 = scmp.ne.s32.totalorder %s2425_s25, %s2071_s19  ;;  %p2073_p10 = pneg %p2432_p7 }
  0x59   : > { %s2076_s21 = scalar_lea.hbm %s2766_s0, 256  ;;  %p2077_p13 = scmp.lt.s32.totalorder %s2425_s25, %s2766_s0 }
  0x5a   : > { %p2074_p11 = pnand %p2073_p10, %p2072_p9  ;;  %p2078_p0 = scmp.lt.s32.totalorder %s2076_s21, %s2071_s19 }
  0x5c   : > { %p2075_p12 = pneg %p2074_p11  ;;  %p2079_p2 = por %p2078_p0, %p2077_p13 }
  0x5e   : > { %p2080_p4 = pnand %p2079_p2, %p2075_p12 }
  0x60   : > { %2083 = shalt.err (!%p2080_p4)
}
  0x61   : > { %s2084_s5 = scalar_lea.vmem %s2428_s2, 128  ;;  %s2215_s13 = smov [#allocation2]  }
  0x62   : > { %p2085_p1 = scmp.ne.s32.totalorder %s2428_s2, %s2084_s5  ;;  %s2089_s29 = sshll.u32 %s2215_s13, 4  ;;  %s2090_s29 = int_to_ptr.vmem [resolvable:$false] %s2089_s29 }
  0x63   : > { %s2091_s26 = scalar_lea.vmem %s2090_s29, 256  ;;  %p2092_p8 = scmp.lt.s32.totalorder %s2428_s2, %s2090_s29 }
  0x64   : > { %p2087_p9 = pnand %p2085_p1, %p2073_p10  ;;  %p2093_p5 = scmp.lt.s32.totalorder %s2091_s26, %s2084_s5 }
  0x66   : > { %p2088_p11 = pneg %p2087_p9  ;;  %p2094_p6 = por %p2093_p5, %p2092_p8 }
  0x68   : > { %p2095_p13 = pnand %p2094_p6, %p2088_p11 }
  0x6a   : > { %2098 = shalt.err (!%p2095_p13)
}
  0x6b   : > { %1893 = dma.hbm_to_vmem [thread:$0]  (!%p2432_p7), %s2425_s25, 128, %s2428_s2, %s385_s28  }
  0x6c   : > { %s406_s19 = scalar_lea.vmem [#allocation5], %s2419_s15  ;;  %s403_s14 = scalar_lea.sflag [#allocation6], %s402_s22 }
  0x6d   : > { %s413_s21 = sshll.u32 %s406_s19, 4  ;;  %s2099_s27 = scalar_lea.hbm %s2439_s16, 128  ;;  %s414_s21 = int_to_ptr.vmem [resolvable:$true] %s413_s21 }
  0x6e   : > { %p2100_p1 = scmp.ne.s32.totalorder %s2439_s16, %s2099_s27  ;;  %s2104_s13 = scalar_lea.hbm %s2767_s1, 256 }
  0x6f   : > { %p2105_p5 = scmp.lt.s32.totalorder %s2439_s16, %s2767_s1  ;;  %p2106_p8 = scmp.lt.s32.totalorder %s2104_s13, %s2099_s27 }
  0x70   : > { %p2102_p4 = pnand %p2100_p1, %p2073_p10 }
  0x71   : > { %p2107_p12 = por %p2106_p8, %p2105_p5 }
  0x72   : > { %p2103_p6 = pneg %p2102_p4 }
  0x74   : > { %p2108_p0 = pnand %p2107_p12, %p2103_p6 }
  0x76   : > { %2111 = shalt.err (!%p2108_p0)
}
  0x77   : > { %s2112_s2 = scalar_lea.vmem %s414_s21, 128  ;;  %s2216_s28 = smov [#allocation5]  }
  0x78   : > { %p2113_p2 = scmp.ne.s32.totalorder %s414_s21, %s2112_s2  ;;  %s2117_s15 = sshll.u32 %s2216_s28, 4  ;;  %s2118_s15 = int_to_ptr.vmem [resolvable:$false] %s2117_s15 }
  0x79   : > { %s2119_s25 = scalar_lea.vmem %s2118_s15, 256  ;;  %p2120_p13 = scmp.lt.s32.totalorder %s414_s21, %s2118_s15 }
  0x7a   : > { %p2115_p9 = pnand %p2113_p2, %p2073_p10  ;;  %p2121_p1 = scmp.lt.s32.totalorder %s2119_s25, %s2112_s2 }
  0x7c   : > { %p2116_p11 = pneg %p2115_p9  ;;  %p2122_p4 = por %p2121_p1, %p2120_p13 }
  0x7e   : > { %p2123_p3 = pnand %p2122_p4, %p2116_p11 }
  0x80   : > { %2126 = shalt.err (!%p2123_p3)
}
  0x81   : > { %1896 = dma.hbm_to_vmem [thread:$0]  (!%p2432_p7), %s2439_s16, 128, %s414_s21, %s403_s14  }
  0x82   : > { %p2805_p6 = scmp.ne.s32.totalorder %s2791_s24, 0 }
  0x83   : > { %s2490_s22 = sand.u32 (!%p2805_p6), 1, %s2199_s18   ;;  %p2806_p10 = scmp.ne.s32.totalorder (!%p2805_p6), %s2800_s12, 0 }
  0x84   : > { %422 = sbr.rel (%p2805_p6) target bundleno = 2907 (0xb5b), region = 64  ;;  %s2493_s19 = sshll.u32 (!%p2805_p6), %s2490_s22, 3 }
  0x85   : > { %s425_s27 = scalar_lea.sflag (!%p2805_p6), [#allocation3], %s2490_s22  ;;  %s428_s4 = scalar_lea.vmem (!%p2805_p6), [#allocation2], %s2493_s19 }
  0x89   : > { %2170 = dma.done.wait (%p2806_p10), %s425_s27, 128  }
  0x8a   : > { %2172 = vsyncadd (%p2806_p10), %s425_s27, 4294967168  ;;  %s433_s3 = sand.u32 1, %s2305_s23   ;;  %s437_s16 = scalar_lea.vmem [#allocation5], %s2493_s19 }
  0x8b   : > { %s434_s24 = scalar_lea.sflag [#allocation6], %s433_s3 }
  0x8c   : > { %2174 = dma.done.wait (%p2806_p10), %s434_s24, 128  }
  0x8d   : > { %2176 = vsyncadd (%p2806_p10), %s434_s24, 4294967168  ;;  %p2807_p3 = scmp.eq.s32.totalorder %s2305_s23, 0 }
  0x8f   : > { %2178 = dma.done.wait (%p2807_p3), [#allocation6], 512   ;;  %p2808_p7 = pmov %p2807_p3 }
  0x90   : > { %p2809_p5 = pmov %p2807_p3 }
  0x91   : > { %2180 = vsyncadd (%p2808_p7), [#allocation6], 4294966784 }
  0x92   : > { %2182 = dma.done.wait (%p2809_p5), [#allocation9], 1024   ;;  %p2810_p8 = pmov %p2807_p3 }
  0x93   : > { %p2811_p12 = pmov %p2807_p3 }
  0x94   : > { %2184 = vsyncadd (%p2810_p8), [#allocation9], 4294966272 }
  0x95   : > { %2186 = dma.done.wait (%p2811_p12), [#allocation12], 512   ;;  %p2812_p0 = pmov %p2807_p3 }
  0x96   : > { %v2217_v0 = vmov 0.0   ;;  %vm2218_vm0 = vmmov 0   ;;  %v2525_v1 = vld [vmem:[#allocation7 + $0x18] sm:$0xff]  ;;  %v2527_v2 = vld [vmem:[#allocation7 + $0x10] sm:$0xff]  ;;  %v2531_v3 = vld [vmem:[#allocation7 + $0x8] sm:$0xff]  ;;  %vm514_vm1 = vcmask 261120  }
  0x97   : > { %2188 = vsyncadd (%p2812_p0), [#allocation12], 4294966784  ;;  %1747 = vmatprep.subr.mxu0 %v2217_v0  ;;  %1755 = vmatprep.mubr.msk.f32.mxu0 %vm2218_vm0, %v2217_v0  ;;  %v2535_v4 = vld [vmem:[#allocation7] sm:$0xff]  ;;  %v2538_v5 = vld [vmem:[%s437_s16] sm:$0xff]  ;;  %vm594_vm2 = vcmask 64512   ;;  %s2219_s14 = smov 96  }
  0x98   : > { %1763 = vmatprep.subr.mxu1 %v2217_v0  ;;  %1765 = vmatprep.mubr.msk.f32.mxu1 %vm2218_vm0, %v2217_v0  ;;  %v2550_v6 = vld [vmem:[%s2772_s6] ss:$0 sm:$0xff]  ;;  %v2553_v10 = vld [vmem:[#allocation8 + $0x18] sm:$0xff]  ;;  %v2563_v12 = vld [vmem:[#allocation8 + $0x10] sm:$0xff]  ;;  %s2220_s5 = smov 120   ;;  %s2221_s25 = smov 64  }
  0x99   : > { %1748 = vmatpush3.msra.mxu0 %v2525_v1  ;;  %v2558_v11 = vld [vmem:[%s428_s4] sm:$0xff]  ;;  %v2573_v14 = vld [vmem:[#allocation10 + $0x18] sm:$0xff]  ;;  %v2579_v16 = vld [vmem:[#allocation10 + $0x10] sm:$0xff]  ;;  %s2222_s3 = smov 32   ;;  %s1696_s24 = sshll.u32 %s2305_s23, 7 }
  0x9a   : > { %1749 = vmatprep.subr.mxu0 %v2217_v0  ;;  %v2585_v17 = vld [vmem:[#allocation10 + $0x8] sm:$0xff]  ;;  %v2594_v19 = vld [vmem:[#allocation10] sm:$0xff]  ;;  %v2626_v28 = vld [vmem:[#allocation11 + $0x18] sm:$0xff]  ;;  %s496_s16 = scalar_lea.vmem [#allocation13], %s2493_s19  ;;  %s2728_s13 = scalar_lea.hbm %s2777_s11, %s1696_s24 }
  0x9b   : > { %1750 = vmatpush3.msra.mxu0 %v2527_v2  ;;  %v2591_v18 = vld [vmem:[#allocation8 + $0x8] sm:$0xff]  ;;  %v2598_v20 = vld [vmem:[#allocation8] sm:$0xff]  ;;  %v2629_v30 = vld [vmem:[#allocation11 + $0x10] sm:$0xff]  ;;  %s1526_s12 = sshll.u32 %s496_s16, 4  ;;  %p2813_p9 = scmp.ne.s32.totalorder %s2801_s30, 0  ;;  %s1527_s12 = int_to_ptr.vmem [resolvable:$true] %s1526_s12 }
  0x9c   : > { %1751 = vmatprep.subr.mxu0 %v2217_v0  ;;  %v2606_v21 = vld [vmem:[%s2773_s7] ss:$0 sm:$0xff]  ;;  %v2635_v31 = vld [vmem:[#allocation11 + $0x8] sm:$0xff]  ;;  %s2127_s29 = scalar_lea.vmem %s1527_s12, 128  ;;  %s2223_s26 = smov [#allocation13]  }
  0x9d   : > { %1752 = vmatpush3.msra.mxu0 %v2531_v3  ;;  %v2623_v25 = vld [vmem:[%s2774_s8] ss:$0 sm:$0xff]  ;;  %p2128_p2 = scmp.ne.s32.totalorder %s1527_s12, %s2127_s29  ;;  %s2131_s2 = sshll.u32 %s2223_s26, 4  ;;  %s2132_s2 = int_to_ptr.vmem [resolvable:$false] %s2131_s2 }
  0x9e   : > { %1753 = vmatprep.subr.mxu0 %v2217_v0  ;;  %v2639_v32 = vld [vmem:[#allocation11] sm:$0xff]  ;;  %s2133_s23 = scalar_lea.vmem %s2132_s2, 256  ;;  %p2134_p1 = scmp.lt.s32.totalorder %s1527_s12, %s2132_s2 }
  0x9f   : > { %1754 = vmatpush3.msra.mxu0 %v2535_v4  ;;  %v2652_v37 = vld [vmem:[%s2776_s10] ss:$0 sm:$0xff]  ;;  %p2129_p11 = pnand %p2128_p2, %p2813_p9  ;;  %p2135_p4 = scmp.lt.s32.totalorder %s2133_s23, %s2127_s29 }
  0xa0   : > { %1756 = vmatmul.mubr.msk.f32.vlgmr.msra.gmra.mxu0 %vm514_vm1, %v2538_v5  ;;  %1758 = vmatprep.subr.mxu0 %v2217_v0  ;;  %v2659_v42 = vld [vmem:[%s2775_s9] ss:$0 sm:$0xff] }
  0xa1   : > { %1760 = vmatprep.mubr.msk.f32.mxu0 %vm2218_vm0, %v2217_v0  ;;  %p2130_p13 = pneg %p2129_p11  ;;  %p2136_p6 = por %p2135_p4, %p2134_p1 }
  0xa3   : > { %p2137_p10 = pnand %p2136_p6, %p2130_p13 }
 0x160   : > { %v584_v7 = vpop.f32.mrf.mxu0 }
 0x161   : > { %v585_v8 = vadd.f32 %v2550_v6, %v584_v7 }
 0x162   : > { %v1757_v9 = vpop.f32.mrf.mxu0 }
 0x163   : > { %677 = vrot.lane.b32.xlu0 %v585_v8, %s2219_s14  ;;  %1759 = vmatpush3.msra.mxu0 %v585_v8 }
 0x164   : > { %1761 = vmatmul.mubr.msk.f32.vlgmr.msra.gmra.mxu0 %vm594_vm2, %v2558_v11  ;;  %1779 = vmatprep.subr.mxu0 %v2217_v0 }
 0x165   : > { %1780 = vmatpush3.msra.mxu0 %v2553_v10  ;;  %1787 = vmatprep.mubr.msk.f32.mxu0 %vm2218_vm0, %v2217_v0 }
 0x166   : > { %1781 = vmatprep.subr.mxu0 %v2217_v0 }
 0x167   : > { %674 = vrot.lane.b32.xlu0 %v2558_v11, %s2220_s5  ;;  %1782 = vmatpush3.msra.mxu0 %v2563_v12 }
 0x168   : > { %1783 = vmatprep.subr.mxu0 %v2217_v0 }
 0x169   : > { %1784 = vmatpush3.msra.mxu0 %v2591_v18 }
 0x16a   : > { %1785 = vmatprep.subr.mxu0 %v2217_v0 }
 0x16b   : > { %1786 = vmatpush3.msra.mxu0 %v2598_v20 }
 0x16c   : > { %1801 = vmatprep.subr.mxu0 %v2217_v0 }
 0x1d5   : > { %v678_v13 = vpop.permute.xlu0 %677 }
 0x1d6   : > { %1764 = vmatpush3.msra.mxu1 %v678_v13 }
 0x1d7   : > { %1768 = vmatprep.subr.mxu1 %v2217_v0 }
 0x1d9   : > { %v2575_v15 = vpop.permute.xlu0 %674 }
 0x1da   : > { %1766 = vmatmul.mubr.msk.f32.vlgmr.msra.gmra.mxu1 %vm594_vm2, %v2575_v15 }
 0x1db   : > { %1769 = vmatpush3.msra.mxu1 %v2573_v14  ;;  %1776 = vmatprep.mubr.msk.f32.mxu1 %vm2218_vm0, %v2217_v0 }
 0x1dc   : > { %1770 = vmatprep.subr.mxu1 %v2217_v0 }
 0x1dd   : > { %1771 = vmatpush3.msra.mxu1 %v2579_v16 }
 0x1de   : > { %1772 = vmatprep.subr.mxu1 %v2217_v0 }
 0x1df   : > { %1773 = vmatpush3.msra.mxu1 %v2585_v17 }
 0x1e0   : > { %1774 = vmatprep.subr.mxu1 %v2217_v0 }
 0x1e1   : > { %1775 = vmatpush3.msra.mxu1 %v2594_v19 }
 0x1e2   : > { %1790 = vmatprep.subr.mxu1 %v2217_v0 }
 0x224   : > { %v664_v22 = vpop.f32.mrf.mxu0 }
 0x225   : > { %v665_v23 = vadd.f32 %v2606_v21, %v664_v22 }
 0x226   : > { %v1762_v24 = vpop.f32.mrf.mxu0 }
 0x227   : > { %1788 = vmatmul.mubr.msk.f32.vlgmr.msra.gmra.mxu0 %vm514_vm1, %v665_v23 }
 0x228   : > { %1802 = vmatpush3.msra.mxu0 %v2525_v1  ;;  %1809 = vmatprep.mubr.msk.f32.mxu0 %vm2218_vm0, %v2217_v0 }
 0x229   : > { %1803 = vmatprep.subr.mxu0 %v2217_v0 }
 0x22a   : > { %1804 = vmatpush3.msra.mxu0 %v2527_v2 }
 0x22b   : > { %1805 = vmatprep.subr.mxu0 %v2217_v0 }
 0x22c   : > { %1806 = vmatpush3.msra.mxu0 %v2531_v3 }
 0x22d   : > { %1807 = vmatprep.subr.mxu0 %v2217_v0 }
 0x22e   : > { %1808 = vmatpush3.msra.mxu0 %v2535_v4 }
 0x22f   : > { %1817 = vmatprep.subr.mxu0 %v2217_v0 }
 0x29a   : > { %v748_v26 = vpop.f32.mrf.mxu1 }
 0x29b   : > { %v749_v27 = vadd.f32 %v2623_v25, %v748_v26 }
 0x29c   : > { %v1767_v29 = vpop.f32.mrf.mxu1 }
 0x29d   : > { %1777 = vmatmul.mubr.msk.f32.vlgmr.msra.gmra.mxu1 %vm514_vm1, %v749_v27 }
 0x29e   : > { %1791 = vmatpush3.msra.mxu1 %v2626_v28  ;;  %1798 = vmatprep.mubr.msk.f32.mxu1 %vm2218_vm0, %v2217_v0 }
 0x29f   : > { %1792 = vmatprep.subr.mxu1 %v2217_v0 }
 0x2a0   : > { %1793 = vmatpush3.msra.mxu1 %v2629_v30 }
 0x2a1   : > { %1794 = vmatprep.subr.mxu1 %v2217_v0 }
 0x2a2   : > { %1795 = vmatpush3.msra.mxu1 %v2635_v31 }
 0x2a3   : > { %1796 = vmatprep.subr.mxu1 %v2217_v0 }
 0x2a4   : > { %1797 = vmatpush3.msra.mxu1 %v2639_v32 }
 0x2a5   : > { %1799 = vmatmul.mubr.msk.f32.vlgmr.msra.gmra.mxu1 %vm514_vm1, %v2538_v5  ;;  %1812 = vmatprep.subr.mxu1 %v2217_v0 }
 0x2a6   : > { %1814 = vmatprep.mubr.msk.f32.mxu1 %vm2218_vm0, %v2217_v0 }
 0x2e7   : > { %v902_v33 = vpop.f32.mrf.mxu0 }
 0x2e9   : > { %v1789_v34 = vpop.f32.mrf.mxu0 }
 0x35d   : > { %v829_v35 = vpop.f32.mrf.mxu1 }
 0x35e   : > { %v903_v41 = vadd.f32 %v902_v33, %v829_v35 }
 0x35f   : > { %v1778_v36 = vpop.f32.mrf.mxu1 }
 0x360   : > { %v912_v43 = vadd.f32 %v2659_v42, %v903_v41 }
 0x365   : > { %v989_v38 = vpop.f32.mrf.mxu1 }
 0x366   : > { %v990_v39 = vadd.f32 %v2652_v37, %v989_v38 }
 0x367   : > { %v1800_v40 = vpop.f32.mrf.mxu1 }
 0x368   : > { %1001 = vrot.lane.b32.xlu1 %v990_v39, %s2221_s25  ;;  %v993_v44 = vadd.f32 %v990_v39, %v912_v43 }
 0x36a   : > { %v1687_v45 = vmul.f32 -1.442695, %v993_v44 }
 0x36c   : > { %1955 = vpow2.f32 %v1687_v45 }
 0x379   : > { %v1956_v46 = vpop.eup %1955 }
 0x37a   : > { %v997_v47 = vadd.f32 1.0, %v1956_v46 }
 0x37c   : > { %1957 = vrcp.f32 %v997_v47 }
 0x389   : > { %v1958_v48 = vpop.eup %1957 }
 0x3da   : > { %v1002_v49 = vpop.permute.xlu1 %1001 }
 0x3db   : > { %v1004_v50 = vmul.f32 %v1958_v48, %v1002_v49 }
 0x3dd   : > { %1006 = vrot.lane.b32.xlu1 %v1004_v50, %s2221_s25 }
 0x44f   : > { %v1007_v51 = vpop.permute.xlu1 %1006 }
 0x450   : > { %v1009_v52 = vadd.f32 %v1007_v51, %v912_v43 }
 0x452   : > { %1959 = vtanh.f32 %v1009_v52 }
 0x45f   : > { %v1960_v53 = vpop.eup %1959 }
 0x460   : > { %1012 = vrot.lane.b32.xlu0 %v1960_v53, %s2221_s25 }
 0x4d2   : > { %v1013_v54 = vpop.permute.xlu0 %1012 }
 0x4d3   : > { %v1015_v55 = vsub.f32 %v2538_v5, %v1013_v54 }
 0x4d5   : > { %1017 = vrot.lane.b32.xlu1 %v1015_v55, %s2222_s3 }
 0x547   : > { %v1018_v56 = vpop.permute.xlu1 %1017 }
 0x548   : > { %v1020_v57 = vmul.f32 %v1958_v48, %v1018_v56 }
 0x54a   : > { %1022 = vrot.lane.b32.xlu0 %v1020_v57, %s2222_s3 }
 0x5bc   : > { %v1023_v58 = vpop.permute.xlu0 %1022 }
 0x5bd   : > { %v2667_v59 = vadd.f32 %v1960_v53, %v1023_v58 }
 0x5bf   : > { %1031 = vrot.lane.b32.xlu1 %v2667_v59, %s2221_s25 }
 0x631   : > { %v1032_v60 = vpop.permute.xlu1 %1031 }
 0x632   : > { %1810 = vmatmul.mubr.msk.f32.vlgmr.msra.gmra.mxu0 %vm514_vm1, %v1032_v60 }
 0x633   : > { %1819 = vmatprep.mubr.msk.f32.mxu0 %vm2218_vm0, %v2217_v0 }
 0x6f2   : > { %v1101_v61 = vpop.f32.mrf.mxu0 }
 0x6f3   : > { %v1102_v62 = vadd.f32 %v2550_v6, %v1101_v61 }
 0x6f4   : > { %v1811_v63 = vpop.f32.mrf.mxu0 }
 0x6f5   : > { %1176 = vrot.lane.b32.xlu0 %v1102_v62, %s2219_s14  ;;  %1813 = vmatpush3.msra.mxu1 %v1102_v62 }
 0x6f6   : > { %1815 = vmatmul.mubr.msk.f32.vlgmr.msra.gmra.mxu1 %vm594_vm2, %v2558_v11  ;;  %1822 = vmatprep.subr.mxu1 %v2217_v0 }
 0x6f7   : > { %1823 = vmatpush3.msra.mxu1 %v2573_v14  ;;  %1830 = vmatprep.mubr.msk.f32.mxu1 %vm2218_vm0, %v2217_v0 }
 0x6f8   : > { %1824 = vmatprep.subr.mxu1 %v2217_v0 }
 0x6f9   : > { %1825 = vmatpush3.msra.mxu1 %v2579_v16 }
 0x6fa   : > { %1826 = vmatprep.subr.mxu1 %v2217_v0 }
 0x6fb   : > { %1827 = vmatpush3.msra.mxu1 %v2585_v17 }
 0x6fc   : > { %1828 = vmatprep.subr.mxu1 %v2217_v0 }
 0x6fd   : > { %1829 = vmatpush3.msra.mxu1 %v2594_v19 }
 0x6fe   : > { %1844 = vmatprep.subr.mxu1 %v2217_v0 }
 0x767   : > { %v1177_v1 = vpop.permute.xlu0 %1176 }
 0x768   : > { %1818 = vmatpush3.msra.mxu0 %v1177_v1 }
 0x769   : > { %1820 = vmatmul.mubr.msk.f32.vlgmr.msra.gmra.mxu0 %vm594_vm2, %v2575_v15  ;;  %1833 = vmatprep.subr.mxu0 %v2217_v0 }
 0x76a   : > { %1834 = vmatpush3.msra.mxu0 %v2553_v10  ;;  %1841 = vmatprep.mubr.msk.f32.mxu0 %vm2218_vm0, %v2217_v0 }
 0x76b   : > { %1835 = vmatprep.subr.mxu0 %v2217_v0 }
 0x76c   : > { %1836 = vmatpush3.msra.mxu0 %v2563_v12 }
 0x76d   : > { %1837 = vmatprep.subr.mxu0 %v2217_v0 }
 0x76e   : > { %1838 = vmatpush3.msra.mxu0 %v2591_v18 }
 0x76f   : > { %1839 = vmatprep.subr.mxu0 %v2217_v0 }
 0x770   : > { %1840 = vmatpush3.msra.mxu0 %v2598_v20 }
 0x7b6   : > { %v1171_v2 = vpop.f32.mrf.mxu1 }
 0x7b7   : > { %v1172_v3 = vadd.f32 %v2606_v21, %v1171_v2 }
 0x7b8   : > { %v1816_v4 = vpop.f32.mrf.mxu1 }
 0x7b9   : > { %1842 = vmatmul.mubr.msk.f32.vlgmr.msra.gmra.mxu0 %vm514_vm1, %v1172_v3 }
 0x829   : > { %v1245_v5 = vpop.f32.mrf.mxu0 }
 0x82a   : > { %v1246_v6 = vadd.f32 %v2623_v25, %v1245_v5 }
 0x82b   : > { %v1821_v7 = vpop.f32.mrf.mxu0 }
 0x82c   : > { %1831 = vmatmul.mubr.msk.f32.vlgmr.msra.gmra.mxu1 %vm514_vm1, %v1246_v6 }
 0x82d   : > { %1845 = vmatpush3.msra.mxu1 %v2626_v28  ;;  %1852 = vmatprep.mubr.msk.f32.mxu1 %vm2218_vm0, %v2217_v0 }
 0x82e   : > { %1846 = vmatprep.subr.mxu1 %v2217_v0 }
 0x82f   : > { %1847 = vmatpush3.msra.mxu1 %v2629_v30 }
 0x830   : > { %1848 = vmatprep.subr.mxu1 %v2217_v0 }
 0x831   : > { %1849 = vmatpush3.msra.mxu1 %v2635_v31 }
 0x832   : > { %1850 = vmatprep.subr.mxu1 %v2217_v0 }
 0x833   : > { %1851 = vmatpush3.msra.mxu1 %v2639_v32 }
 0x834   : > { %1853 = vmatmul.mubr.msk.f32.vlgmr.msra.gmra.mxu1 %vm514_vm1, %v1032_v60 }
 0x879   : > { %v1399_v8 = vpop.f32.mrf.mxu0 }
 0x87b   : > { %v1843_v9 = vpop.f32.mrf.mxu0 }
 0x8ec   : > { %v1326_v10 = vpop.f32.mrf.mxu1 }
 0x8ed   : > { %v1400_v15 = vadd.f32 %v1399_v8, %v1326_v10 }
 0x8ee   : > { %v1832_v11 = vpop.f32.mrf.mxu1 }
 0x8ef   : > { %v1403_v16 = vadd.f32 %v2659_v42, %v1400_v15 }
 0x8f4   : > { %v1474_v12 = vpop.f32.mrf.mxu1 }
 0x8f5   : > { %v1475_v13 = vadd.f32 %v2652_v37, %v1474_v12 }
 0x8f6   : > { %v1854_v14 = vpop.f32.mrf.mxu1 }
 0x8f7   : > { %1486 = vrot.lane.b32.xlu1 %v1475_v13, %s2221_s25  ;;  %v1478_v17 = vadd.f32 %v1475_v13, %v1403_v16 }
 0x8f9   : > { %v1694_v18 = vmul.f32 -1.442695, %v1478_v17 }
 0x8fb   : > { %1961 = vpow2.f32 %v1694_v18 }
 0x908   : > { %v1962_v0 = vpop.eup %1961 }
 0x909   : > { %v1482_v19 = vadd.f32 1.0, %v1962_v0 }
 0x90b   : > { %1963 = vrcp.f32 %v1482_v19 }
 0x918   : > { %v1964_v20 = vpop.eup %1963 }
 0x969   : > { %v1487_v21 = vpop.permute.xlu1 %1486 }
 0x96a   : > { %v1489_v22 = vmul.f32 %v1964_v20, %v1487_v21 }
 0x96c   : > { %1491 = vrot.lane.b32.xlu0 %v1489_v22, %s2221_s25 }
 0x9de   : > { %v1492_v23 = vpop.permute.xlu0 %1491 }
 0x9df   : > { %v1494_v24 = vadd.f32 %v1492_v23, %v1403_v16 }
 0x9e1   : > { %1965 = vtanh.f32 %v1494_v24 }
 0x9ee   : > { %v1966_v25 = vpop.eup %1965 }
 0x9ef   : > { %v1496_v26 = vsub.f32 %v2667_v59, %v1966_v25 }
 0x9f1   : > { %1498 = vrot.lane.b32.xlu1 %v1496_v26, %s2219_s14  ;;  %s1513_s14 = scalar_lea.sflag [#allocation4], %s2490_s22 }
 0xa63   : > { %v1499_v27 = vpop.permute.xlu1 %1498 }
 0xa64   : > { %v1501_v28 = vmul.f32 %v1964_v20, %v1499_v27 }
 0xa66   : > { %1503 = vrot.lane.b32.xlu0 %v1501_v28, %s2222_s3 }
 0xad8   : > { %v1504_v29 = vpop.permute.xlu0 %1503 }
 0xad9   : > { %v1506_v30 = vadd.f32 %v1966_v25, %v1504_v29 }
 0xadb   : > { %1508 = vrot.lane.b32.xlu1 %v1506_v30, %s2221_s25 }
 0xb4d   : > { %v1509_v31 = vpop.permute.xlu1 %1508 }
 0xb4e   : > { %1511 = vst.msk [vmem:[%s496_s16] sm:$0xff] %vm514_vm1, %v1509_v31 }
 0xb4f   : > { %2140 = shalt.err (!%p2137_p10)
}
 0xb50   : > { %s2141_s19 = scalar_lea.hbm %s2728_s13, 128  ;;  %s2145_s15 = scalar_lea.hbm %s2777_s11, 256 }
 0xb51   : > { %p2142_p3 = scmp.ne.s32.totalorder %s2728_s13, %s2141_s19  ;;  %p2146_p8 = scmp.lt.s32.totalorder %s2728_s13, %s2777_s11 }
 0xb52   : > { %p2147_p12 = scmp.lt.s32.totalorder %s2145_s15, %s2141_s19 }
 0xb53   : > { %p2143_p7 = pnand %p2142_p3, %p2813_p9 }
 0xb54   : > { %p2148_p0 = por %p2147_p12, %p2146_p8 }
 0xb55   : > { %p2144_p5 = pneg %p2143_p7 }
 0xb57   : > { %p2149_p2 = pnand %p2148_p0, %p2144_p5 }
 0xb59   : > { %2152 = shalt.err (!%p2149_p2)
}
 0xb5a   : > { %1875 = dma.vmem_to_hbm [thread:$0]  (%p2813_p9), %s1527_s12, 128, %s2728_s13, %s1513_s14  }
 0xb5b PF: > { %s2814_s4 = sld [smem:[#allocation23_spill]]  ;;  %s1538_s3 = sand.u32 1, %s2195_s17  }
 0xb5c   : > { %p2816_p13 = scmp.ge.s32.totalorder %s2207_s20, 2  ;;  %s1539_s24 = scalar_lea.sflag [#allocation4], %s1538_s3 }
 0xb61   : > { %p2815_p11 = scmp.ne.s32.totalorder %s2814_s4, 0 }
 0xb63   : > { %p1898_p1 = pnand %p2816_p13, %p2815_p11 }
 0xb65   : > { %p1899_p4 = pneg %p1898_p1 }
 0xb67   : > { %2190 = dma.done.wait (%p1899_p4), %s1539_s24, 128  }
 0xb68   : > { %2192 = vsyncadd (%p1899_p4), %s1539_s24, 4294967168  ;;  %s2817_s20 = sld [smem:[#allocation21_spill]]  ;;  %s2820_s17 = smov %s2199_s18 }
 0xb69   : > { %s2818_s16 = sld [smem:[#allocation20_spill]] }
 0xb6a   : > { %s2819_s19 = sld [smem:[#allocation22_spill]] }
 0xb6e   : > { %p29_p6 = scmp.ge.s32.totalorder %s2817_s20, 4  }
 0xb6f   : > { %s2821_s18 = smov %s2818_s16 }
 0xb70   :  { %31 = sbr.rel (!%p29_p6) target bundleno = 14 (0xe), region = 138 }
 0xb75   :  { %1544 = vsyncpa [#allocation3], 1 }
 0xb76   :  { %1546 = vsyncpa [#allocation3 + $0x1], 1 }
 0xb77   :  { %1547 = vsyncpa [#allocation6], 1 }
 0xb78   :  { %1549 = vsyncpa [#allocation6 + $0x1], 1 }
 0xb79   :  { %1550 = vsyncpa [#allocation9], 1 }
 0xb7a   :  { %1551 = vsyncpa [#allocation12], 1 }
 0xb7b   :  { %1552 = vsyncpa [#allocation4], 1 }
 0xb7c   :  { %1554 = vsyncpa [#allocation4 + $0x1], 1 }

</bundles_post_ra>
